<compile_context>
chip_gen: v7x
topology: tpu7x:2x2x1
jax: 0.10.0
libtpu: 0.0.40
codegen_flags: <defaults>
</compile_context>

<pallas_src>
import functools

import jax
import jax.numpy as jnp
from jax.experimental import pallas as pl
from jax.experimental.pallas import tpu as pltpu

_INV_SQRT2 = 0.7071067811865476
_BN_EPS = 1e-5
_VMEM_LIMIT = 32 * 1024 * 1024  # safe on v5e (128 MiB), v6e (128 MiB), v7x (64 MiB)


def _gelu(x):
    # exact (erf-based) GELU, matching PyTorch nn.GELU() default
    return 0.5 * x * (1.0 + jax.lax.erf(x * _INV_SQRT2))


def _round_up(x, m):
    return (x + m - 1) // m * m


def _pick_rows(h, cap=8):
    """Row-strip height: largest divisor of h that is <= cap."""
    t = min(cap, h)
    while t > 1 and h % t:
        t -= 1
    return max(t, 1)


# ---------------------------------------------------------------------------
# Kernel 1: tiled fused  [M,K] @ [K,N] + bias  -> GELU -> BN affine
# Used for the patch-embedding conv (as a patch matmul) and the 1x1 conv.
# Grid = (M/tm, N/tn, K/tk); f32 accumulator in VMEM scratch; K axis last.
# bias/scale/shift are packed as rows 0/1/2 of one (8, N) aux array.
# ---------------------------------------------------------------------------
def _mm_gelu_bn_kernel(x_ref, w_ref, aux_ref, o_ref, acc_ref):
    @pl.when(pl.program_id(2) == 0)
    def _():
        acc_ref[...] = jnp.zeros_like(acc_ref)

    acc_ref[...] += jnp.dot(x_ref[...], w_ref[...],
                            preferred_element_type=jnp.float32)

    @pl.when(pl.program_id(2) == pl.num_programs(2) - 1)
    def _():
        aux = aux_ref[...]                   # (8, tn): rows 0/1/2 = b/scale/shift
        y = _gelu(acc_ref[...] + aux[0:1, :])
        o_ref[...] = (y * aux[1:2, :] + aux[2:3, :]).astype(o_ref.dtype)


def mm_gelu_bn(x2d, w, b, scale, shift):
    M, K = x2d.shape
    N = w.shape[1]

    # Pick tiles first, then pad up to tile multiples (zero padding is inert:
    # padded K columns/rows are zero, padded N columns are sliced off).
    tm = min(512, _round_up(M, 8))
    tk = min(512, _round_up(K, 128))
    tn = min(512, _round_up(N, 128))
    M_pad = _round_up(M, tm)
    K_pad = _round_up(K, tk)
    N_pad = _round_up(N, tn)

    xp = jnp.pad(x2d, ((0, M_pad - M), (0, K_pad - K))).astype(jnp.bfloat16)
    wp = jnp.pad(w, ((0, K_pad - K), (0, N_pad - N))).astype(jnp.bfloat16)
    aux = jnp.zeros((8, N_pad), jnp.float32)
    aux = (aux.at[0, :N].set(b.astype(jnp.float32))
              .at[1, :N].set(scale.astype(jnp.float32))
              .at[2, :N].set(shift.astype(jnp.float32)))

    out = pl.pallas_call(
        _mm_gelu_bn_kernel,
        out_shape=jax.ShapeDtypeStruct((M_pad, N_pad), jnp.float32),
        grid=(M_pad // tm, N_pad // tn, K_pad // tk),
        in_specs=[
            pl.BlockSpec((tm, tk), lambda i, j, k: (i, k)),
            pl.BlockSpec((tk, tn), lambda i, j, k: (k, j)),
            pl.BlockSpec((8, tn), lambda i, j, k: (0, j)),
        ],
        out_specs=pl.BlockSpec((tm, tn), lambda i, j, k: (i, j)),
        scratch_shapes=[pltpu.VMEM((tm, tn), jnp.float32)],
        compiler_params=pltpu.CompilerParams(
            dimension_semantics=("parallel", "parallel", "arbitrary"),
            vmem_limit_bytes=_VMEM_LIMIT),
    )(xp, wp, aux)

    if M_pad != M or N_pad != N:
        out = out[:M, :N]
    return out


# ---------------------------------------------------------------------------
# Kernel 2: depthwise conv (kxk, 'same') + bias -> GELU -> BN -> residual add
# Grid over (batch, channel blocks). One (1, H, W, cb) block per step; the
# 'same' halo lives in a VMEM scratch (no HBM padded copy, no second residual
# read). Only the halo is zeroed per step; the interior is overwritten by the
# copy. The conv is evaluated in row strips so the live f32 accumulator is
# (th, W, cb). bias/scale/shift packed as rows 0/1/2 of one (8, C) aux array.
# ---------------------------------------------------------------------------
def _dw_gelu_bn_res_kernel(x_ref, w_ref, aux_ref, o_ref, xpad_scr,
                           *, k, H, W, pad_lo, pad_hi, th):
    C = x_ref.shape[-1]
    Hp_ = H + pad_lo + pad_hi
    Wp_ = W + pad_lo + pad_hi

    # Zero only the halo strips (interior gets fully overwritten below).
    if pad_lo > 0:
        xpad_scr[:pad_lo, :, :] = jnp.zeros((pad_lo, Wp_, C), jnp.float32)
        xpad_scr[:, :pad_lo, :] = jnp.zeros((Hp_, pad_lo, C), jnp.float32)
    if pad_hi > 0:
        xpad_scr[pad_lo + H:, :, :] = jnp.zeros((pad_hi, Wp_, C), jnp.float32)
        xpad_scr[:, pad_lo + W:, :] = jnp.zeros((Hp_, pad_hi, C), jnp.float32)
    xpad_scr[pad_lo:pad_lo + H, pad_lo:pad_lo + W, :] = x_ref[0]

    wv = w_ref[...]                    # (k*k, C): loaded once per grid step
    aux = aux_ref[...]                 # (8, C): rows 0/1/2 = bias/scale/shift
    bias = aux[0, :]
    scale = aux[1, :]
    shift = aux[2, :]

    for s in range(H // th):           # row strips -> small live accumulator
        r0 = s * th
        acc = jnp.zeros((th, W, C), jnp.float32)
        for dy in range(k):
            for dx in range(k):
                patch = xpad_scr[r0 + dy:r0 + dy + th, dx:dx + W, :]
                acc = acc + patch * wv[dy * k + dx]
        y = _gelu(acc + bias) * scale + shift
        # residual read comes from the same input block (no duplicate input)
        o_ref[0, r0:r0 + th, :, :] = y + x_ref[0, r0:r0 + th, :, :]


def _pick_channel_block(C, H, W, pad_tot):
    """Largest 128-multiple channel block dividing C that fits a VMEM budget."""
    if C % 128 != 0:
        return C  # not lane-blockable; use full C (small dims like the demo)
    budget = 20 * 1024 * 1024
    per_c = ((H + pad_tot) * (W + pad_tot) + 4 * H * W) * 4  # scratch + 2x in + 2x out
    best = 128
    cb = 128
    while cb <= C:
        if C % cb == 0 and per_c * cb <= budget:
            best = cb
        cb += 128
    return best


def dw_gelu_bn_residual(x, w_kkC, b, scale, shift, k):
    N, H, W, C = x.shape
    # PyTorch padding='same' (stride 1): lo = (k-1)//2, hi = (k-1)-lo
    pad_lo = (k - 1) // 2
    pad_hi = (k - 1) - pad_lo
    th = _pick_rows(H, 8)
    cb = _pick_channel_block(C, H, W, pad_lo + pad_hi)

    aux = jnp.zeros((8, C), jnp.float32)
    aux = (aux.at[0, :].set(b.astype(jnp.float32))
              .at[1, :].set(scale.astype(jnp.float32))
              .at[2, :].set(shift.astype(jnp.float32)))

    kernel = functools.partial(_dw_gelu_bn_res_kernel, k=k, H=H, W=W,
                               pad_lo=pad_lo, pad_hi=pad_hi, th=th)
    return pl.pallas_call(
        kernel,
        out_shape=jax.ShapeDtypeStruct((N, H, W, C), jnp.float32),
        grid=(N, C // cb),
        in_specs=[
            pl.BlockSpec((1, H, W, cb), lambda n, c: (n, 0, 0, c)),
            pl.BlockSpec((k * k, cb), lambda n, c: (0, c)),
            pl.BlockSpec((8, cb), lambda n, c: (0, c)),
        ],
        out_specs=pl.BlockSpec((1, H, W, cb), lambda n, c: (n, 0, 0, c)),
        scratch_shapes=[
            pltpu.VMEM((H + pad_lo + pad_hi, W + pad_lo + pad_hi, cb),
                       jnp.float32)],
        compiler_params=pltpu.CompilerParams(
            dimension_semantics=("parallel", "parallel"),
            vmem_limit_bytes=_VMEM_LIMIT),
    )(x, w_kkC, aux)


# ---------------------------------------------------------------------------
# Kernel 3: global average pool over (H,W) + Linear classifier head.
# Chunked reduction over H*W with a VMEM running-sum scratch; the matmul +
# bias epilogue runs only on the last grid step. Chunk is sized from a VMEM
# budget; classifier N-dim padded to 128 (lane-dense output).
# ---------------------------------------------------------------------------
def _pool_fc_kernel(x_ref, w_ref, b_ref, o_ref, acc_ref, *, inv_hw):
    @pl.when(pl.program_id(0) == 0)
    def _():
        acc_ref[...] = jnp.zeros_like(acc_ref)

    acc_ref[...] += jnp.sum(x_ref[...], axis=1)

    @pl.when(pl.program_id(0) == pl.num_programs(0) - 1)
    def _():
        pooled = (acc_ref[...] * inv_hw).astype(jnp.bfloat16)
        o_ref[...] = (jnp.dot(pooled, w_ref[...],
                              preferred_element_type=jnp.float32)
                      + b_ref[...])


def pool_fc(x_nhwc, w, b):
    N, H, W, C = x_nhwc.shape
    NC = w.shape[1]
    HW = H * W

    # Chunk sized so the pipelined x block stays ~<=4 MiB.
    cap = max(8, ((4 * 1024 * 1024) // (N * C * 4)) // 8 * 8)
    chunk = min(cap, _round_up(HW, 8))
    HW_pad = _round_up(HW, chunk)
    NC_pad = _round_up(NC, 128)  # lane-dense output

    x3 = x_nhwc.reshape(N, HW, C)
    if HW_pad != HW:
        # zero rows do not change the sum; we divide by the true H*W
        x3 = jnp.pad(x3, ((0, 0), (0, HW_pad - HW), (0, 0)))
    wp = jnp.pad(w, ((0, 0), (0, NC_pad - NC))).astype(jnp.bfloat16)
    bp = jnp.pad(b, (0, NC_pad - NC)).reshape(1, NC_pad).astype(jnp.float32)

    kernel = functools.partial(_pool_fc_kernel, inv_hw=1.0 / HW)
    out = pl.pallas_call(
        kernel,
        out_shape=jax.ShapeDtypeStruct((N, NC_pad), jnp.float32),
        grid=(HW_pad // chunk,),
        in_specs=[
            pl.BlockSpec((N, chunk, C), lambda c: (0, c, 0)),
            pl.BlockSpec((C, NC_pad), lambda c: (0, 0)),
            pl.BlockSpec((1, NC_pad), lambda c: (0, 0)),
        ],
        out_specs=pl.BlockSpec((N, NC_pad), lambda c: (0, 0)),
        scratch_shapes=[pltpu.VMEM((N, C), jnp.float32)],
        compiler_params=pltpu.CompilerParams(
            dimension_semantics=("arbitrary",),
            vmem_limit_bytes=_VMEM_LIMIT),
    )(x3, wp, bp)
    return out[:, :NC]


# ---------------------------------------------------------------------------
# Parameter construction (deterministic, synthetic) + forward pass
# ---------------------------------------------------------------------------
def _bn_fold(gamma, beta, mean, var):
    scale = gamma / jnp.sqrt(var + _BN_EPS)
    shift = beta - mean * scale
    return scale, shift


def _bn_params(key, c):
    kg, kb, km, kv = jax.random.split(key, 4)
    gamma = 1.0 + 0.1 * jax.random.normal(kg, (c,), jnp.float32)
    beta = 0.1 * jax.random.normal(kb, (c,), jnp.float32)
    mean = 0.1 * jax.random.normal(km, (c,), jnp.float32)
    var = 0.5 + jnp.abs(jax.random.normal(kv, (c,), jnp.float32))
    return _bn_fold(gamma, beta, mean, var)


def init_params(key, *, dim, depth, kernel_size, patch_size, num_classes,
                in_ch=3):
    keys = jax.random.split(key, 4 + depth)
    params = {}

    # patch embedding: Conv2d(in_ch, dim, patch_size, stride=patch_size) as a
    # matmul of shape (p*p*in_ch, dim), plus bias, plus folded BN.
    k0, k0b = jax.random.split(keys[0])
    params["pe_w"] = 0.1 * jax.random.normal(
        k0, (patch_size * patch_size * in_ch, dim), jnp.float32)
    params["pe_b"] = 0.1 * jax.random.normal(k0b, (dim,), jnp.float32)
    params["pe_scale"], params["pe_shift"] = _bn_params(keys[1], dim)

    blocks = []
    for d in range(depth):
        bk = jax.random.split(keys[4 + d], 6)
        blk = {}
        # depthwise conv weight laid out (k*k, dim)
        blk["dw_w"] = 0.1 * jax.random.normal(
            bk[0], (kernel_size * kernel_size, dim), jnp.float32)
        blk["dw_b"] = 0.1 * jax.random.normal(bk[1], (dim,), jnp.float32)
        blk["bn1_scale"], blk["bn1_shift"] = _bn_params(bk[2], dim)
        # pointwise 1x1 conv weight, (dim_in, dim_out) for x @ W
        blk["pw_w"] = 0.1 * jax.random.normal(bk[3], (dim, dim), jnp.float32)
        blk["pw_b"] = 0.1 * jax.random.normal(bk[4], (dim,), jnp.float32)
        blk["bn2_scale"], blk["bn2_shift"] = _bn_params(bk[5], dim)
        blocks.append(blk)
    params["blocks"] = blocks

    # classifier head: Linear(dim, num_classes) as (dim, num_classes)
    kf, kfb = jax.random.split(keys[2])
    params["fc_w"] = 0.1 * jax.random.normal(kf, (dim, num_classes),
                                             jnp.float32)
    params["fc_b"] = 0.1 * jax.random.normal(kfb, (num_classes,), jnp.float32)
    return params


def convmixer_forward(x_nchw, params, *, dim, kernel_size, patch_size):
    N, Cin, H, W = x_nchw.shape
    p = patch_size
    Hp, Wp = H // p, W // p

    # NCHW -> NHWC (glue, once at the boundary)
    x = jnp.transpose(x_nchw, (0, 2, 3, 1)).astype(jnp.float32)

    # --- patch embedding: extract non-overlapping patches (XLA glue on the
    #     small 3-channel input), then the tiled fused matmul/GELU/BN kernel.
    patches = (x.reshape(N, Hp, p, Wp, p, Cin)
                 .transpose(0, 1, 3, 2, 4, 5)
                 .reshape(N * Hp * Wp, p * p * Cin))
    y = mm_gelu_bn(patches, params["pe_w"], params["pe_b"],
                   params["pe_scale"], params["pe_shift"])
    y = y.reshape(N, Hp, Wp, dim)

    # --- backbone ---
    for blk in params["blocks"]:
        # Residual(depthwise conv -> GELU -> BN) fused in one kernel
        y = dw_gelu_bn_residual(y, blk["dw_w"], blk["dw_b"],
                                blk["bn1_scale"], blk["bn1_shift"],
                                kernel_size)
        # pointwise conv -> GELU -> BN fused in one tiled matmul kernel
        y2 = mm_gelu_bn(y.reshape(N * Hp * Wp, dim), blk["pw_w"],
                        blk["pw_b"], blk["bn2_scale"], blk["bn2_shift"])
        y = y2.reshape(N, Hp, Wp, dim)

    # --- head: global average pool + linear ---
    out = pool_fc(y, params["fc_w"], params["fc_b"])
    return out  # (N, num_classes)


if __name__ == "__main__":
    # small, ConvMixer-consistent config
    dim, depth, kernel_size, patch_size, num_classes = 32, 2, 3, 4, 16
    batch, in_ch, img = 2, 3, 16

    root = jax.random.PRNGKey(0)
    k_x, k_p = jax.random.split(root)
    x = jax.random.normal(k_x, (batch, in_ch, img, img), jnp.float32)  # NCHW

    params = init_params(k_p, dim=dim, depth=depth, kernel_size=kernel_size,
                         patch_size=patch_size, num_classes=num_classes,
                         in_ch=in_ch)

    fwd = jax.jit(functools.partial(convmixer_forward, dim=dim,
                                    kernel_size=kernel_size,
                                    patch_size=patch_size))
    out = jax.block_until_ready(fwd(x, params))

    assert out.shape == (batch, num_classes), out.shape
    assert jnp.all(jnp.isfinite(out))
    print("KERNEL_OK")
</pallas_src>

<mosaic_0001>
module attributes {stable_mosaic.version = 11 : i64} {
  func.func @_mm_gelu_bn_kernel(%arg0: i32, %arg1: i32, %arg2: i32, %arg3: memref<32x128xbf16, #tpu.memory_space<vmem>>, %arg4: memref<128x128xbf16, #tpu.memory_space<vmem>>, %arg5: memref<8x128xf32, #tpu.memory_space<vmem>>, %arg6: memref<32x128xf32, #tpu.memory_space<vmem>>, %arg7: memref<32x128xf32, #tpu.memory_space<vmem>>) attributes {dimension_semantics = [#tpu.dimension_semantics<parallel>, #tpu.dimension_semantics<parallel>, #tpu.dimension_semantics<arbitrary>], iteration_bounds = array<i64: 1, 1, 1>, scalar_prefetch = 0 : i64, scratch_operands = 1 : i64, tpu.core_type = #tpu.core_type<tc>, window_params = [{transform_indices = @transform_0, window_bounds = array<i64: 32, 128>}, {transform_indices = @transform_1, window_bounds = array<i64: 128, 128>}, {transform_indices = @transform_2, window_bounds = array<i64: 8, 128>}, {transform_indices = @transform_3, window_bounds = array<i64: 32, 128>}]} {
    %c0_i32 = arith.constant 0 : i32
    %0 = arith.cmpi eq, %arg2, %c0_i32 : i32
    %1 = arith.extui %0 : i1 to i32
    %c0_i32_0 = arith.constant 0 : i32
    %2 = arith.cmpi ne, %1, %c0_i32_0 : i32
    scf.if %2 {
      %cst_10 = arith.constant 0.000000e+00 : f32
      %12 = vector.broadcast %cst_10 : f32 to vector<32x128xf32>
      %c0_11 = arith.constant 0 : index
      %c0_12 = arith.constant 0 : index
      %13 = vector.load %arg7[%c0_11, %c0_12] : memref<32x128xf32, #tpu.memory_space<vmem>>, vector<32x128xf32>
      tpu.vector_store %arg7[%c0_11, %c0_12], %12 {strides = array<i32>} : memref<32x128xf32, #tpu.memory_space<vmem>>, vector<32x128xf32>,
    } else {
    }
    %c0 = arith.constant 0 : index
    %c0_1 = arith.constant 0 : index
    %3 = vector.load %arg7[%c0, %c0_1] : memref<32x128xf32, #tpu.memory_space<vmem>>, vector<32x128xf32>
    %c0_2 = arith.constant 0 : index
    %c0_3 = arith.constant 0 : index
    %4 = vector.load %arg3[%c0_2, %c0_3] : memref<32x128xbf16, #tpu.memory_space<vmem>>, vector<32x128xbf16>
    %c0_4 = arith.constant 0 : index
    %c0_5 = arith.constant 0 : index
    %5 = vector.load %arg4[%c0_4, %c0_5] : memref<128x128xbf16, #tpu.memory_space<vmem>>, vector<128x128xbf16>
    %cst = arith.constant dense<0.000000e+00> : vector<32x128xf32>
    %6 = tpu.matmul %4, %5, %cst {dimension_numbers = #tpu.dot_dimension_numbers<[1], [0], [0], [1], [0, 0, 1, 1], [], []>} : vector<32x128xbf16>, vector<128x128xbf16>, vector<32x128xf32> -> vector<32x128xf32>
    %7 = arith.addf %3, %6 : vector<32x128xf32>
    %c0_6 = arith.constant 0 : index
    %c0_7 = arith.constant 0 : index
    %8 = vector.load %arg7[%c0_6, %c0_7] : memref<32x128xf32, #tpu.memory_space<vmem>>, vector<32x128xf32>
    tpu.vector_store %arg7[%c0_6, %c0_7], %7 {strides = array<i32>} : memref<32x128xf32, #tpu.memory_space<vmem>>, vector<32x128xf32>,
    %c0_i32_8 = arith.constant 0 : i32
    %9 = arith.cmpi eq, %arg2, %c0_i32_8 : i32
    %10 = arith.extui %9 : i1 to i32
    %c0_i32_9 = arith.constant 0 : i32
    %11 = arith.cmpi ne, %10, %c0_i32_9 : i32
    scf.if %11 {
      %c0_10 = arith.constant 0 : index
      %c0_11 = arith.constant 0 : index
      %12 = vector.load %arg5[%c0_10, %c0_11] : memref<8x128xf32, #tpu.memory_space<vmem>>, vector<8x128xf32>
      %c0_12 = arith.constant 0 : index
      %c0_13 = arith.constant 0 : index
      %13 = vector.load %arg7[%c0_12, %c0_13] : memref<32x128xf32, #tpu.memory_space<vmem>>, vector<32x128xf32>
      %14 = vector.extract_strided_slice %12 {offsets = [0, 0], sizes = [1, 128], strides = [1, 1]} : vector<8x128xf32> to vector<1x128xf32>
      %15 = vector.broadcast %14 : vector<1x128xf32> to vector<32x128xf32>
      %16 = arith.addf %13, %15 : vector<32x128xf32>
      %cst_14 = arith.constant 5.000000e-01 : f32
      %17 = vector.broadcast %cst_14 : f32 to vector<32x128xf32>
      %18 = arith.mulf %17, %16 : vector<32x128xf32>
      %cst_15 = arith.constant 0.707106769 : f32
      %19 = vector.broadcast %cst_15 : f32 to vector<32x128xf32>
      %20 = arith.mulf %16, %19 : vector<32x128xf32>
      %21 = math.erf %20 : vector<32x128xf32>
      %cst_16 = arith.constant 1.000000e+00 : f32
      %22 = vector.broadcast %cst_16 : f32 to vector<32x128xf32>
      %23 = arith.addf %22, %21 : vector<32x128xf32>
      %24 = arith.mulf %18, %23 : vector<32x128xf32>
      %25 = vector.extract_strided_slice %12 {offsets = [1, 0], sizes = [1, 128], strides = [1, 1]} : vector<8x128xf32> to vector<1x128xf32>
      %26 = vector.broadcast %25 : vector<1x128xf32> to vector<32x128xf32>
      %27 = arith.mulf %24, %26 : vector<32x128xf32>
      %28 = vector.extract_strided_slice %12 {offsets = [2, 0], sizes = [1, 128], strides = [1, 1]} : vector<8x128xf32> to vector<1x128xf32>
      %29 = vector.broadcast %28 : vector<1x128xf32> to vector<32x128xf32>
      %30 = arith.addf %27, %29 : vector<32x128xf32>
      %c0_17 = arith.constant 0 : index
      %c0_18 = arith.constant 0 : index
      %31 = vector.load %arg6[%c0_17, %c0_18] : memref<32x128xf32, #tpu.memory_space<vmem>>, vector<32x128xf32>
      tpu.vector_store %arg6[%c0_17, %c0_18], %30 {strides = array<i32>} : memref<32x128xf32, #tpu.memory_space<vmem>>, vector<32x128xf32>,
    } else {
    }
    return
  }
  func.func @transform_0(%arg0: i32, %arg1: i32, %arg2: i32) -> (i32, i32) {
    %c0_i32 = arith.constant 0 : i32
    return %arg0, %arg2 : i32, i32
  }
  func.func @transform_1(%arg0: i32, %arg1: i32, %arg2: i32) -> (i32, i32) {
    %c0_i32 = arith.constant 0 : i32
    return %arg2, %arg1 : i32, i32
  }
  func.func @transform_2(%arg0: i32, %arg1: i32, %arg2: i32) -> (i32, i32) {
    %c0_i32 = arith.constant 0 : i32
    %c0_i32_0 = arith.constant 0 : i32
    return %c0_i32, %arg1 : i32, i32
  }
  func.func @transform_3(%arg0: i32, %arg1: i32, %arg2: i32) -> (i32, i32) {
    %c0_i32 = arith.constant 0 : i32
    return %arg0, %arg1 : i32, i32
  }
}

module attributes {stable_mosaic.version = 11 : i64} {
  func.func @_dw_gelu_bn_res_kernel(%arg0: i32, %arg1: i32, %arg2: memref<1x4x4x32xf32, #tpu.memory_space<vmem>>, %arg3: memref<9x32xf32, #tpu.memory_space<vmem>>, %arg4: memref<8x32xf32, #tpu.memory_space<vmem>>, %arg5: memref<1x4x4x32xf32, #tpu.memory_space<vmem>>, %arg6: memref<6x6x32xf32, #tpu.memory_space<vmem>>) attributes {dimension_semantics = [#tpu.dimension_semantics<parallel>, #tpu.dimension_semantics<parallel>], iteration_bounds = array<i64: 2, 1>, scalar_prefetch = 0 : i64, scratch_operands = 1 : i64, tpu.core_type = #tpu.core_type<tc>, window_params = [{transform_indices = @transform_0, window_bounds = array<i64: 1, 4, 4, 32>}, {transform_indices = @transform_1, window_bounds = array<i64: 9, 32>}, {transform_indices = @transform_2, window_bounds = array<i64: 8, 32>}, {transform_indices = @transform_3, window_bounds = array<i64: 1, 4, 4, 32>}]} {
    %cst = arith.constant 0.000000e+00 : f32
    %0 = vector.broadcast %cst : f32 to vector<1x6x32xf32>
    %c0 = arith.constant 0 : index
    %c0_0 = arith.constant 0 : index
    %c0_1 = arith.constant 0 : index
    %1 = vector.load %arg6[%c0, %c0_0, %c0_1] : memref<6x6x32xf32, #tpu.memory_space<vmem>>, vector<1x6x32xf32>
    tpu.vector_store %arg6[%c0, %c0_0, %c0_1], %0 {strides = array<i32>} : memref<6x6x32xf32, #tpu.memory_space<vmem>>, vector<1x6x32xf32>,
    %cst_2 = arith.constant 0.000000e+00 : f32
    %2 = vector.broadcast %cst_2 : f32 to vector<6x1x32xf32>
    %c0_3 = arith.constant 0 : index
    %c0_4 = arith.constant 0 : index
    %c0_5 = arith.constant 0 : index
    %3 = vector.load %arg6[%c0_3, %c0_4, %c0_5] : memref<6x6x32xf32, #tpu.memory_space<vmem>>, vector<6x1x32xf32>
    tpu.vector_store %arg6[%c0_3, %c0_4, %c0_5], %2 {strides = array<i32>} : memref<6x6x32xf32, #tpu.memory_space<vmem>>, vector<6x1x32xf32>,
    %cst_6 = arith.constant 0.000000e+00 : f32
    %4 = vector.broadcast %cst_6 : f32 to vector<1x6x32xf32>
    %c5 = arith.constant 5 : index
    %c0_7 = arith.constant 0 : index
    %c0_8 = arith.constant 0 : index
    %5 = vector.load %arg6[%c5, %c0_7, %c0_8] : memref<6x6x32xf32, #tpu.memory_space<vmem>>, vector<1x6x32xf32>
    tpu.vector_store %arg6[%c5, %c0_7, %c0_8], %4 {strides = array<i32>} : memref<6x6x32xf32, #tpu.memory_space<vmem>>, vector<1x6x32xf32>,
    %cst_9 = arith.constant 0.000000e+00 : f32
    %6 = vector.broadcast %cst_9 : f32 to vector<6x1x32xf32>
    %c0_10 = arith.constant 0 : index
    %c5_11 = arith.constant 5 : index
    %c0_12 = arith.constant 0 : index
    %7 = vector.load %arg6[%c0_10, %c5_11, %c0_12] : memref<6x6x32xf32, #tpu.memory_space<vmem>>, vector<6x1x32xf32>
    tpu.vector_store %arg6[%c0_10, %c5_11, %c0_12], %6 {strides = array<i32>} : memref<6x6x32xf32, #tpu.memory_space<vmem>>, vector<6x1x32xf32>,
    %c0_13 = arith.constant 0 : index
    %c0_14 = arith.constant 0 : index
    %c0_15 = arith.constant 0 : index
    %c0_16 = arith.constant 0 : index
    %8 = vector.load %arg2[%c0_13, %c0_14, %c0_15, %c0_16] : memref<1x4x4x32xf32, #tpu.memory_space<vmem>>, vector<1x4x4x32xf32>
    %9 = vector.shape_cast %8 : vector<1x4x4x32xf32> to vector<4x4x32xf32>
    %c1 = arith.constant 1 : index
    %c1_17 = arith.constant 1 : index
    %c0_18 = arith.constant 0 : index
    %10 = vector.load %arg6[%c1, %c1_17, %c0_18] : memref<6x6x32xf32, #tpu.memory_space<vmem>>, vector<4x4x32xf32>
    tpu.vector_store %arg6[%c1, %c1_17, %c0_18], %9 {strides = array<i32>} : memref<6x6x32xf32, #tpu.memory_space<vmem>>, vector<4x4x32xf32>,
    %c0_19 = arith.constant 0 : index
    %c0_20 = arith.constant 0 : index
    %11 = vector.load %arg3[%c0_19, %c0_20] : memref<9x32xf32, #tpu.memory_space<vmem>>, vector<9x32xf32>
    %c0_21 = arith.constant 0 : index
    %c0_22 = arith.constant 0 : index
    %12 = vector.load %arg4[%c0_21, %c0_22] : memref<8x32xf32, #tpu.memory_space<vmem>>, vector<8x32xf32>
    %13 = vector.extract_strided_slice %12 {offsets = [0, 0], sizes = [1, 32], strides = [1, 1]} : vector<8x32xf32> to vector<1x32xf32>
    %14 = vector.shape_cast %13 : vector<1x32xf32> to vector<32xf32>
    %15 = vector.extract_strided_slice %12 {offsets = [1, 0], sizes = [1, 32], strides = [1, 1]} : vector<8x32xf32> to vector<1x32xf32>
    %16 = vector.shape_cast %15 : vector<1x32xf32> to vector<32xf32>
    %17 = vector.extract_strided_slice %12 {offsets = [2, 0], sizes = [1, 32], strides = [1, 1]} : vector<8x32xf32> to vector<1x32xf32>
    %18 = vector.shape_cast %17 : vector<1x32xf32> to vector<32xf32>
    %cst_23 = arith.constant 0.000000e+00 : f32
    %19 = vector.broadcast %cst_23 : f32 to vector<4x4x32xf32>
    %c0_24 = arith.constant 0 : index
    %c0_25 = arith.constant 0 : index
    %c0_26 = arith.constant 0 : index
    %20 = vector.load %arg6[%c0_24, %c0_25, %c0_26] : memref<6x6x32xf32, #tpu.memory_space<vmem>>, vector<4x4x32xf32>
    %21 = vector.extract_strided_slice %11 {offsets = [0, 0], sizes = [1, 32], strides = [1, 1]} : vector<9x32xf32> to vector<1x32xf32>
    %22 = vector.shape_cast %21 : vector<1x32xf32> to vector<32xf32>
    %23 = vector.shape_cast %22 : vector<32xf32> to vector<1x1x32xf32>
    %24 = vector.broadcast %23 : vector<1x1x32xf32> to vector<4x4x32xf32>
    %25 = arith.mulf %20, %24 : vector<4x4x32xf32>
    %26 = arith.addf %19, %25 : vector<4x4x32xf32>
    %c0_27 = arith.constant 0 : index
    %c1_28 = arith.constant 1 : index
    %c0_29 = arith.constant 0 : index
    %27 = vector.load %arg6[%c0_27, %c1_28, %c0_29] : memref<6x6x32xf32, #tpu.memory_space<vmem>>, vector<4x4x32xf32>
    %28 = vector.extract_strided_slice %11 {offsets = [1, 0], sizes = [1, 32], strides = [1, 1]} : vector<9x32xf32> to vector<1x32xf32>
    %29 = vector.shape_cast %28 : vector<1x32xf32> to vector<32xf32>
    %30 = vector.shape_cast %29 : vector<32xf32> to vector<1x1x32xf32>
    %31 = vector.broadcast %30 : vector<1x1x32xf32> to vector<4x4x32xf32>
    %32 = arith.mulf %27, %31 : vector<4x4x32xf32>
    %33 = arith.addf %26, %32 : vector<4x4x32xf32>
    %c0_30 = arith.constant 0 : index
    %c2 = arith.constant 2 : index
    %c0_31 = arith.constant 0 : index
    %34 = vector.load %arg6[%c0_30, %c2, %c0_31] : memref<6x6x32xf32, #tpu.memory_space<vmem>>, vector<4x4x32xf32>
    %35 = vector.extract_strided_slice %11 {offsets = [2, 0], sizes = [1, 32], strides = [1, 1]} : vector<9x32xf32> to vector<1x32xf32>
    %36 = vector.shape_cast %35 : vector<1x32xf32> to vector<32xf32>
    %37 = vector.shape_cast %36 : vector<32xf32> to vector<1x1x32xf32>
    %38 = vector.broadcast %37 : vector<1x1x32xf32> to vector<4x4x32xf32>
    %39 = arith.mulf %34, %38 : vector<4x4x32xf32>
    %40 = arith.addf %33, %39 : vector<4x4x32xf32>
    %c1_32 = arith.constant 1 : index
    %c0_33 = arith.constant 0 : index
    %c0_34 = arith.constant 0 : index
    %41 = vector.load %arg6[%c1_32, %c0_33, %c0_34] : memref<6x6x32xf32, #tpu.memory_space<vmem>>, vector<4x4x32xf32>
    %42 = vector.extract_strided_slice %11 {offsets = [3, 0], sizes = [1, 32], strides = [1, 1]} : vector<9x32xf32> to vector<1x32xf32>
    %43 = vector.shape_cast %42 : vector<1x32xf32> to vector<32xf32>
    %44 = vector.shape_cast %43 : vector<32xf32> to vector<1x1x32xf32>
    %45 = vector.broadcast %44 : vector<1x1x32xf32> to vector<4x4x32xf32>
    %46 = arith.mulf %41, %45 : vector<4x4x32xf32>
    %47 = arith.addf %40, %46 : vector<4x4x32xf32>
    %c1_35 = arith.constant 1 : index
    %c1_36 = arith.constant 1 : index
    %c0_37 = arith.constant 0 : index
    %48 = vector.load %arg6[%c1_35, %c1_36, %c0_37] : memref<6x6x32xf32, #tpu.memory_space<vmem>>, vector<4x4x32xf32>
    %49 = vector.extract_strided_slice %11 {offsets = [4, 0], sizes = [1, 32], strides = [1, 1]} : vector<9x32xf32> to vector<1x32xf32>
    %50 = vector.shape_cast %49 : vector<1x32xf32> to vector<32xf32>
    %51 = vector.shape_cast %50 : vector<32xf32> to vector<1x1x32xf32>
    %52 = vector.broadcast %51 : vector<1x1x32xf32> to vector<4x4x32xf32>
    %53 = arith.mulf %48, %52 : vector<4x4x32xf32>
    %54 = arith.addf %47, %53 : vector<4x4x32xf32>
    %c1_38 = arith.constant 1 : index
    %c2_39 = arith.constant 2 : index
    %c0_40 = arith.constant 0 : index
    %55 = vector.load %arg6[%c1_38, %c2_39, %c0_40] : memref<6x6x32xf32, #tpu.memory_space<vmem>>, vector<4x4x32xf32>
    %56 = vector.extract_strided_slice %11 {offsets = [5, 0], sizes = [1, 32], strides = [1, 1]} : vector<9x32xf32> to vector<1x32xf32>
    %57 = vector.shape_cast %56 : vector<1x32xf32> to vector<32xf32>
    %58 = vector.shape_cast %57 : vector<32xf32> to vector<1x1x32xf32>
    %59 = vector.broadcast %58 : vector<1x1x32xf32> to vector<4x4x32xf32>
    %60 = arith.mulf %55, %59 : vector<4x4x32xf32>
    %61 = arith.addf %54, %60 : vector<4x4x32xf32>
    %c2_41 = arith.constant 2 : index
    %c0_42 = arith.constant 0 : index
    %c0_43 = arith.constant 0 : index
    %62 = vector.load %arg6[%c2_41, %c0_42, %c0_43] : memref<6x6x32xf32, #tpu.memory_space<vmem>>, vector<4x4x32xf32>
    %63 = vector.extract_strided_slice %11 {offsets = [6, 0], sizes = [1, 32], strides = [1, 1]} : vector<9x32xf32> to vector<1x32xf32>
    %64 = vector.shape_cast %63 : vector<1x32xf32> to vector<32xf32>
    %65 = vector.shape_cast %64 : vector<32xf32> to vector<1x1x32xf32>
    %66 = vector.broadcast %65 : vector<1x1x32xf32> to vector<4x4x32xf32>
    %67 = arith.mulf %62, %66 : vector<4x4x32xf32>
    %68 = arith.addf %61, %67 : vector<4x4x32xf32>
    %c2_44 = arith.constant 2 : index
    %c1_45 = arith.constant 1 : index
    %c0_46 = arith.constant 0 : index
    %69 = vector.load %arg6[%c2_44, %c1_45, %c0_46] : memref<6x6x32xf32, #tpu.memory_space<vmem>>, vector<4x4x32xf32>
    %70 = vector.extract_strided_slice %11 {offsets = [7, 0], sizes = [1, 32], strides = [1, 1]} : vector<9x32xf32> to vector<1x32xf32>
    %71 = vector.shape_cast %70 : vector<1x32xf32> to vector<32xf32>
    %72 = vector.shape_cast %71 : vector<32xf32> to vector<1x1x32xf32>
    %73 = vector.broadcast %72 : vector<1x1x32xf32> to vector<4x4x32xf32>
    %74 = arith.mulf %69, %73 : vector<4x4x32xf32>
    %75 = arith.addf %68, %74 : vector<4x4x32xf32>
    %c2_47 = arith.constant 2 : index
    %c2_48 = arith.constant 2 : index
    %c0_49 = arith.constant 0 : index
    %76 = vector.load %arg6[%c2_47, %c2_48, %c0_49] : memref<6x6x32xf32, #tpu.memory_space<vmem>>, vector<4x4x32xf32>
    %77 = vector.extract_strided_slice %11 {offsets = [8, 0], sizes = [1, 32], strides = [1, 1]} : vector<9x32xf32> to vector<1x32xf32>
    %78 = vector.shape_cast %77 : vector<1x32xf32> to vector<32xf32>
    %79 = vector.shape_cast %78 : vector<32xf32> to vector<1x1x32xf32>
    %80 = vector.broadcast %79 : vector<1x1x32xf32> to vector<4x4x32xf32>
    %81 = arith.mulf %76, %80 : vector<4x4x32xf32>
    %82 = arith.addf %75, %81 : vector<4x4x32xf32>
    %83 = vector.shape_cast %14 : vector<32xf32> to vector<1x1x32xf32>
    %84 = vector.broadcast %83 : vector<1x1x32xf32> to vector<4x4x32xf32>
    %85 = arith.addf %82, %84 : vector<4x4x32xf32>
    %cst_50 = arith.constant 5.000000e-01 : f32
    %86 = vector.broadcast %cst_50 : f32 to vector<4x4x32xf32>
    %87 = arith.mulf %86, %85 : vector<4x4x32xf32>
    %cst_51 = arith.constant 0.707106769 : f32
    %88 = vector.broadcast %cst_51 : f32 to vector<4x4x32xf32>
    %89 = arith.mulf %85, %88 : vector<4x4x32xf32>
    %90 = math.erf %89 : vector<4x4x32xf32>
    %cst_52 = arith.constant 1.000000e+00 : f32
    %91 = vector.broadcast %cst_52 : f32 to vector<4x4x32xf32>
    %92 = arith.addf %91, %90 : vector<4x4x32xf32>
    %93 = arith.mulf %87, %92 : vector<4x4x32xf32>
    %94 = vector.shape_cast %16 : vector<32xf32> to vector<1x1x32xf32>
    %95 = vector.broadcast %94 : vector<1x1x32xf32> to vector<4x4x32xf32>
    %96 = arith.mulf %93, %95 : vector<4x4x32xf32>
    %97 = vector.shape_cast %18 : vector<32xf32> to vector<1x1x32xf32>
    %98 = vector.broadcast %97 : vector<1x1x32xf32> to vector<4x4x32xf32>
    %99 = arith.addf %96, %98 : vector<4x4x32xf32>
    %c0_53 = arith.constant 0 : index
    %c0_54 = arith.constant 0 : index
    %c0_55 = arith.constant 0 : index
    %c0_56 = arith.constant 0 : index
    %100 = vector.load %arg2[%c0_53, %c0_54, %c0_55, %c0_56] : memref<1x4x4x32xf32, #tpu.memory_space<vmem>>, vector<1x4x4x32xf32>
    %101 = vector.shape_cast %100 : vector<1x4x4x32xf32> to vector<4x4x32xf32>
    %102 = arith.addf %99, %101 : vector<4x4x32xf32>
    %c0_57 = arith.constant 0 : index
    %c0_58 = arith.constant 0 : index
    %c0_59 = arith.constant 0 : index
    %c0_60 = arith.constant 0 : index
    %103 = vector.load %arg5[%c0_57, %c0_58, %c0_59, %c0_60] : memref<1x4x4x32xf32, #tpu.memory_space<vmem>>, vector<1x4x4x32xf32>
    %104 = vector.shape_cast %103 : vector<1x4x4x32xf32> to vector<4x4x32xf32>
    %105 = vector.shape_cast %102 : vector<4x4x32xf32> to vector<1x4x4x32xf32>
    tpu.vector_store %arg5[%c0_57, %c0_58, %c0_59, %c0_60], %105 {strides = array<i32>} : memref<1x4x4x32xf32, #tpu.memory_space<vmem>>, vector<1x4x4x32xf32>,
    return
  }
  func.func @transform_0(%arg0: i32, %arg1: i32) -> (i32, i32, i32, i32) {
    %c0_i32 = arith.constant 0 : i32
    %c0_i32_0 = arith.constant 0 : i32
    %c0_i32_1 = arith.constant 0 : i32
    return %arg0, %c0_i32, %c0_i32_0, %arg1 : i32, i32, i32, i32
  }
  func.func @transform_1(%arg0: i32, %arg1: i32) -> (i32, i32) {
    %c0_i32 = arith.constant 0 : i32
    %c0_i32_0 = arith.constant 0 : i32
    return %c0_i32, %arg1 : i32, i32
  }
  func.func @transform_2(%arg0: i32, %arg1: i32) -> (i32, i32) {
    %c0_i32 = arith.constant 0 : i32
    %c0_i32_0 = arith.constant 0 : i32
    return %c0_i32, %arg1 : i32, i32
  }
  func.func @transform_3(%arg0: i32, %arg1: i32) -> (i32, i32, i32, i32) {
    %c0_i32 = arith.constant 0 : i32
    %c0_i32_0 = arith.constant 0 : i32
    %c0_i32_1 = arith.constant 0 : i32
    return %arg0, %c0_i32, %c0_i32_0, %arg1 : i32, i32, i32, i32
  }
}

module attributes {stable_mosaic.version = 11 : i64} {
  func.func @_pool_fc_kernel(%arg0: i32, %arg1: memref<2x16x32xf32, #tpu.memory_space<vmem>>, %arg2: memref<32x128xbf16, #tpu.memory_space<vmem>>, %arg3: memref<1x128xf32, #tpu.memory_space<vmem>>, %arg4: memref<2x128xf32, #tpu.memory_space<vmem>>, %arg5: memref<2x32xf32, #tpu.memory_space<vmem>>) attributes {dimension_semantics = [#tpu.dimension_semantics<arbitrary>], iteration_bounds = array<i64: 1>, scalar_prefetch = 0 : i64, scratch_operands = 1 : i64, tpu.core_type = #tpu.core_type<tc>, window_params = [{transform_indices = @transform_0, window_bounds = array<i64: 2, 16, 32>}, {pipeline_mode = #tpu.pipeline_mode<synchronous>, transform_indices = @transform_1, window_bounds = array<i64: 32, 128>}, {pipeline_mode = #tpu.pipeline_mode<synchronous>, transform_indices = @transform_2, window_bounds = array<i64: 1, 128>}, {pipeline_mode = #tpu.pipeline_mode<synchronous>, transform_indices = @transform_3, window_bounds = array<i64: 2, 128>}]} {
    %c0_i32 = arith.constant 0 : i32
    %0 = arith.cmpi eq, %arg0, %c0_i32 : i32
    %1 = arith.extui %0 : i1 to i32
    %c0_i32_0 = arith.constant 0 : i32
    %2 = arith.cmpi ne, %1, %c0_i32_0 : i32
    scf.if %2 {
      %cst_9 = arith.constant 0.000000e+00 : f32
      %11 = vector.broadcast %cst_9 : f32 to vector<2x32xf32>
      %c0_10 = arith.constant 0 : index
      %c0_11 = arith.constant 0 : index
      %12 = vector.load %arg5[%c0_10, %c0_11] : memref<2x32xf32, #tpu.memory_space<vmem>>, vector<2x32xf32>
      tpu.vector_store %arg5[%c0_10, %c0_11], %11 {strides = array<i32>} : memref<2x32xf32, #tpu.memory_space<vmem>>, vector<2x32xf32>,
    } else {
    }
    %c0 = arith.constant 0 : index
    %c0_1 = arith.constant 0 : index
    %3 = vector.load %arg5[%c0, %c0_1] : memref<2x32xf32, #tpu.memory_space<vmem>>, vector<2x32xf32>
    %c0_2 = arith.constant 0 : index
    %c0_3 = arith.constant 0 : index
    %c0_4 = arith.constant 0 : index
    %4 = vector.load %arg1[%c0_2, %c0_3, %c0_4] : memref<2x16x32xf32, #tpu.memory_space<vmem>>, vector<2x16x32xf32>
    %cst = arith.constant dense<0.000000e+00> : vector<2x32xf32>
    %5 = vector.multi_reduction <add>, %4, %cst [1] : vector<2x16x32xf32> to vector<2x32xf32>
    %6 = arith.addf %3, %5 : vector<2x32xf32>
    %c0_5 = arith.constant 0 : index
    %c0_6 = arith.constant 0 : index
    %7 = vector.load %arg5[%c0_5, %c0_6] : memref<2x32xf32, #tpu.memory_space<vmem>>, vector<2x32xf32>
    tpu.vector_store %arg5[%c0_5, %c0_6], %6 {strides = array<i32>} : memref<2x32xf32, #tpu.memory_space<vmem>>, vector<2x32xf32>,
    %c0_i32_7 = arith.constant 0 : i32
    %8 = arith.cmpi eq, %arg0, %c0_i32_7 : i32
    %9 = arith.extui %8 : i1 to i32
    %c0_i32_8 = arith.constant 0 : i32
    %10 = arith.cmpi ne, %9, %c0_i32_8 : i32
    scf.if %10 {
      %c0_9 = arith.constant 0 : index
      %c0_10 = arith.constant 0 : index
      %11 = vector.load %arg5[%c0_9, %c0_10] : memref<2x32xf32, #tpu.memory_space<vmem>>, vector<2x32xf32>
      %cst_11 = arith.constant 6.250000e-02 : f32
      %12 = vector.broadcast %cst_11 : f32 to vector<2x32xf32>
      %13 = arith.mulf %11, %12 : vector<2x32xf32>
      %14 = arith.truncf %13 : vector<2x32xf32> to vector<2x32xbf16>
      %c0_12 = arith.constant 0 : index
      %c0_13 = arith.constant 0 : index
      %15 = vector.load %arg2[%c0_12, %c0_13] : memref<32x128xbf16, #tpu.memory_space<vmem>>, vector<32x128xbf16>
      %cst_14 = arith.constant dense<0.000000e+00> : vector<2x128xf32>
      %16 = tpu.matmul %14, %15, %cst_14 {dimension_numbers = #tpu.dot_dimension_numbers<[1], [0], [0], [1], [0, 0, 1, 1], [], []>} : vector<2x32xbf16>, vector<32x128xbf16>, vector<2x128xf32> -> vector<2x128xf32>
      %c0_15 = arith.constant 0 : index
      %c0_16 = arith.constant 0 : index
      %17 = vector.load %arg3[%c0_15, %c0_16] : memref<1x128xf32, #tpu.memory_space<vmem>>, vector<1x128xf32>
      %18 = vector.broadcast %17 : vector<1x128xf32> to vector<2x128xf32>
      %19 = arith.addf %16, %18 : vector<2x128xf32>
      %c0_17 = arith.constant 0 : index
      %c0_18 = arith.constant 0 : index
      %20 = vector.load %arg4[%c0_17, %c0_18] : memref<2x128xf32, #tpu.memory_space<vmem>>, vector<2x128xf32>
      tpu.vector_store %arg4[%c0_17, %c0_18], %19 {strides = array<i32>} : memref<2x128xf32, #tpu.memory_space<vmem>>, vector<2x128xf32>,
    } else {
    }
    return
  }
  func.func @transform_0(%arg0: i32) -> (i32, i32, i32) {
    %c0_i32 = arith.constant 0 : i32
    %c0_i32_0 = arith.constant 0 : i32
    %c0_i32_1 = arith.constant 0 : i32
    return %c0_i32, %arg0, %c0_i32_0 : i32, i32, i32
  }
  func.func @transform_1(%arg0: i32) -> (i32, i32) {
    %c0_i32 = arith.constant 0 : i32
    %c0_i32_0 = arith.constant 0 : i32
    %c0_i32_1 = arith.constant 0 : i32
    return %c0_i32, %c0_i32_0 : i32, i32
  }
  func.func @transform_2(%arg0: i32) -> (i32, i32) {
    %c0_i32 = arith.constant 0 : i32
    %c0_i32_0 = arith.constant 0 : i32
    %c0_i32_1 = arith.constant 0 : i32
    return %c0_i32, %c0_i32_0 : i32, i32
  }
  func.func @transform_3(%arg0: i32) -> (i32, i32) {
    %c0_i32 = arith.constant 0 : i32
    %c0_i32_0 = arith.constant 0 : i32
    %c0_i32_1 = arith.constant 0 : i32
    return %c0_i32, %c0_i32_0 : i32, i32
  }
}

</mosaic_0001>

<bundles_post_ra>
// kernel: convmixer_forward.6
= control target key start
LH: loop header
LB: loop body
LE: loop exit
PB: predicated region body
PF: predicated region fallthrough
CT: control target
= control target key end

     0   :  { %v172_v10 = vlaneseq  ;;  %s347_s1 = inlined_call_operand.vmem [shape: bf16[128,128], index: 1, kind: input, shape index: {}]   ;;  %s348_s0 = inlined_call_operand.vmem [shape: bf16[32,128], index: 0, kind: input, shape index: {}]   ;;  %s349_s2 = inlined_call_operand.vmem [shape: f32[8,128], index: 2, kind: input, shape index: {}]   ;;  %s350_s3 = inlined_call_operand.vmem [shape: f32[32,128], index: 3, kind: output, shape index: {}]  }
   0x1   :  { %v264_v0 = vld [vmem:[%s347_s1] sm:$0xff]   ;;  %v265_v1 = vld [vmem:[%s347_s1 + $0x8] sm:$0xff]   ;;  %v266_v2 = vld [vmem:[%s347_s1 + $0x10] sm:$0xff]  }
   0x2   :  { %244 = vmatprep.subr.bf16.mxu0 %v264_v0  ;;  %v267_v3 = vld [vmem:[%s347_s1 + $0x18] sm:$0xff]   ;;  %v272_v4 = vld [vmem:[%s348_s0] sm:$0xff]   ;;  %v269_v6 = vld [vmem:[%s347_s1 + $0x28] sm:$0xff]   ;;  %v173_v11 = vshrl.u32 %v172_v10, 7 }
   0x3   :  { %245 = vmatpush3.bf16.msra.mxu0 %v264_v0  ;;  %260 = vmatprep.mubr.bf16.mxu0 %v272_v4  ;;  %v268_v5 = vld [vmem:[%s347_s1 + $0x20] sm:$0xff]   ;;  %v270_v7 = vld [vmem:[%s347_s1 + $0x30] sm:$0xff]   ;;  %v271_v8 = vld [vmem:[%s347_s1 + $0x38] sm:$0xff]  }
   0x4   :  { %246 = vmatprep.subr.bf16.mxu0 %v265_v1  ;;  %v273_v9 = vld [vmem:[%s348_s0 + $0x8] sm:$0xff]   ;;  %v174_v12 = vsub.s32 0, %v173_v11  ;;  %v167_v13 = vld [vmem:[%s349_s2] sm:$0xff]  ;;  %v202_v27 = vsub.s32 1, %v173_v11  ;;  %v210_v28 = vsub.s32 2, %v173_v11 }
   0x6   :  { %v175_v14 = vrot.slane %v167_v13, %v174_v12  ;;  %v203_v33 = vrot.slane %v167_v13, %v202_v27  ;;  %v211_v39 = vrot.slane %v167_v13, %v210_v28 }
   0x7   :  { %247 = vmatpush3.bf16.msra.mxu0 %v265_v1 }
   0x8   :  { %248 = vmatprep.subr.bf16.mxu0 %v266_v2 }
   0xb   :  { %249 = vmatpush3.bf16.msra.mxu0 %v266_v2 }
   0xc   :  { %250 = vmatprep.subr.bf16.mxu0 %v267_v3 }
   0xf   :  { %251 = vmatpush3.bf16.msra.mxu0 %v267_v3 }
  0x10   :  { %252 = vmatprep.subr.bf16.mxu0 %v268_v5 }
  0x13   :  { %253 = vmatpush3.bf16.msra.mxu0 %v268_v5 }
  0x14   :  { %254 = vmatprep.subr.bf16.mxu0 %v269_v6 }
  0x17   :  { %255 = vmatpush3.bf16.msra.mxu0 %v269_v6 }
  0x18   :  { %256 = vmatprep.subr.bf16.mxu0 %v270_v7 }
  0x1b   :  { %257 = vmatpush3.bf16.msra.mxu0 %v270_v7 }
  0x1c   :  { %258 = vmatprep.subr.bf16.mxu0 %v271_v8 }
  0x1f   :  { %259 = vmatpush3.bf16.msra.mxu0 %v271_v8 }
  0x22   :  { %261 = vmatmul.mubr.bf16.vlgmr.msra.gmra.mrb[0].mxu0 %v273_v9 }
  0xf5   :  { %v262_v15 = vpop.f32.mrb[0].mxu0 }
  0xf6   :  { %v178_v16 = vadd.f32 %v262_v15, %v175_v14  ;;  %v141_v17 = vpop.f32.mrb[1].mxu0 }
  0xf7   :  { %v176_v18 = vadd.f32 %v175_v14, %v141_v17  ;;  %v263_v19 = vpop.f32.mrb[2].mxu0 }
  0xf8   :  { %v186_v20 = vmul.f32 0.70710677, %v178_v16  ;;  %v179_v21 = vadd.f32 %v263_v19, %v175_v14  ;;  %v144_v22 = vpop.f32.mrb[3].mxu0  ;;  %v182_v31 = vmul.f32 0.5, %v178_v16 }
  0xf9   :  { %v184_v23 = vmul.f32 0.70710677, %v176_v18  ;;  %v177_v24 = vadd.f32 %v175_v14, %v144_v22  ;;  %v180_v35 = vmul.f32 0.5, %v176_v18 }
  0xfa   :  { %274 = verf.f32 %v186_v20  ;;  %v187_v25 = vmul.f32 0.70710677, %v179_v21  ;;  %v183_v40 = vmul.f32 0.5, %v179_v21 }
  0xfb   :  { %276 = verf.f32 %v184_v23  ;;  %v185_v26 = vmul.f32 0.70710677, %v177_v24  ;;  %v181_v43 = vmul.f32 0.5, %v177_v24 }
  0xfc   :  { %278 = verf.f32 %v187_v25 }
  0xfd   :  { %280 = verf.f32 %v185_v26 }
 0x104   :  { %v275_v29 = vpop.eup %274 }
 0x105   :  { %v277_v30 = vpop.eup %276  ;;  %v194_v32 = vadd.f32 1.0, %v275_v29 }
 0x106   :  { %v279_v34 = vpop.eup %278  ;;  %v192_v36 = vadd.f32 1.0, %v277_v30 }
 0x107   :  { %v281_v37 = vpop.eup %280  ;;  %v198_v38 = vmul.f32 %v194_v32, %v182_v31  ;;  %v195_v41 = vadd.f32 1.0, %v279_v34 }
 0x108   :  { %v196_v42 = vmul.f32 %v192_v36, %v180_v35  ;;  %v193_v44 = vadd.f32 1.0, %v281_v37 }
 0x109   :  { %v206_v45 = vmul.f32 %v203_v33, %v198_v38  ;;  %v199_v46 = vmul.f32 %v195_v41, %v183_v40 }
 0x10a   :  { %v204_v47 = vmul.f32 %v203_v33, %v196_v42  ;;  %v197_v48 = vmul.f32 %v193_v44, %v181_v43 }
 0x10b   :  { %v214_v49 = vadd.f32 %v211_v39, %v206_v45  ;;  %v207_v50 = vmul.f32 %v203_v33, %v199_v46 }
 0x10c   :  { %v212_v51 = vadd.f32 %v211_v39, %v204_v47  ;;  %v205_v52 = vmul.f32 %v203_v33, %v197_v48 }
 0x10d   :  { %218 = vst [vmem:[%s350_s3 + $0x10] sm:$0xff] %v214_v49  ;;  %v215_v53 = vadd.f32 %v211_v39, %v207_v50 }
 0x10e   :  { %216 = vst [vmem:[%s350_s3] sm:$0xff] %v212_v51  ;;  %v213_v54 = vadd.f32 %v211_v39, %v205_v52 }
 0x10f   :  { %219 = vst [vmem:[%s350_s3 + $0x18] sm:$0xff] %v215_v53 }
 0x110   :  { %217 = vst [vmem:[%s350_s3 + $0x8] sm:$0xff] %v213_v54 }

// kernel: convmixer_forward.7
= control target key start
LH: loop header
LB: loop body
LE: loop exit
PB: predicated region body
PF: predicated region fallthrough
CT: control target
= control target key end

     0   :  { %s675_s12 = smov 0   ;;  %s677_s13 = smov 0   ;;  %s814_s0 = inlined_call_operand.vmem [shape: f32[2,4,4,32], index: 0, kind: input, shape index: {}]   ;;  %s815_s1 = inlined_call_operand.vmem [shape: f32[9,32], index: 1, kind: input, shape index: {}]   ;;  %s816_s2 = inlined_call_operand.vmem [shape: f32[8,32], index: 2, kind: input, shape index: {}]   ;;  %s817_s3 = inlined_call_operand.vmem [shape: f32[2,4,4,32], index: 3, kind: output, shape index: {}]  }
   0x1   :  { %s679_s14 = smov 0  }
   0x2 LB: > { %s25_s15 = sadd.s32 1, %s648_s13  ;;  %p587_p0 = scmp.ge.s32.totalorder %s652_s14, 1  ;;  %s652_s14 = sphi %s679_s14, %s13_s14   ;;  %s648_s13 = sphi %s677_s13, %s819_s13   ;;  %s644_s12 = sphi %s675_s12, %s818_s12  }
   0x3   : > { %p27_p1 = scmp.ge.s32.totalorder %s25_s15, 2  ;;  %p174_p2 = scmp.lt.s32.totalorder %s652_s14, 3 }
   0x5   : > { %s821_s15 = smov (%p27_p1, %s25_s15), 0  ;;  %p175_p3 = pnand %p587_p0, %p174_p2 }
   0x6   : > { %vm236_vm0 = vcmask (!%p175_p3), 259072   ;;  %vm238_vm1 = vcmask (!%p175_p3), 253952   ;;  %p212_p4 = scmp.lt.s32.totalorder (!%p175_p3), %s644_s12, 1  ;;  %v654_v0 = vmov (!%p175_p3), 0.0   ;;  %v270_v1 = vlaneseq (!%p175_p3)  ;;  %v263_v3 = vld [vmem:[%s815_s1] sm:$0xff] (!%p175_p3) }
   0x7   : > { %178 = sbr.rel (%p175_p3) target bundleno = 76 (0x4c), region = 32  ;;  %237 = vst.msk [vmem:[#allocation2] sm:$0x3f] (!%p175_p3), %vm236_vm0, %v654_v0  ;;  %vm258_vm2 = vcmask (!%p175_p3), 257024  }
   0x8   : > { %240 = vst.msk [vmem:[#allocation2 + $0x8] sm:$0x1] (!%p175_p3), %vm238_vm1, %v654_v0  ;;  %241 = vst.msk [vmem:[#allocation2 + $0x10] sm:$0x1] (!%p175_p3), %vm238_vm1, %v654_v0  ;;  %v710_v2 = vshrl.u32 (!%p175_p3), %v270_v1, 7 }
   0x9   : > { %242 = vst.msk [vmem:[#allocation2 + $0x18] sm:$0x1] (!%p175_p3), %vm238_vm1, %v654_v0  ;;  %243 = vst.msk [vmem:[#allocation2 + $0x20] sm:$0x1] (!%p175_p3), %vm238_vm1, %v654_v0 }
   0xa   : > { %244 = vst.msk [vmem:[#allocation2 + $0x28] sm:$0x1] (!%p175_p3), %vm238_vm1, %v654_v0  ;;  %248 = vst.msk [vmem:[#allocation2 + $0xd] sm:$0x1] (!%p175_p3), %vm238_vm1, %v654_v0  ;;  %v272_v4 = vsub.s32 (!%p175_p3), 0, %v710_v2  ;;  %v288_v5 = vsub.s32 (!%p175_p3), 1, %v710_v2 }
   0xb   : > { %249 = vst.msk [vmem:[#allocation2 + $0x15] sm:$0x1] (!%p175_p3), %vm238_vm1, %v654_v0  ;;  %250 = vst.msk [vmem:[#allocation2 + $0x1d] sm:$0x1] (!%p175_p3), %vm238_vm1, %v654_v0  ;;  %v304_v6 = vsub.s32 (!%p175_p3), 2, %v710_v2  ;;  %v320_v19 = vsub.s32 (!%p175_p3), 3, %v710_v2 }
   0xc   : > { %251 = vst.msk [vmem:[#allocation2 + $0x25] sm:$0x1] (!%p175_p3), %vm238_vm1, %v654_v0  ;;  %239 = vst.msk [vmem:[#allocation2] sm:$0x1] (!%p175_p3), %vm238_vm1, %v654_v0  ;;  %v273_v11 = vrot.slane (!%p175_p3), %v263_v3, %v272_v4  ;;  %v289_v12 = vrot.slane (!%p175_p3), %v263_v3, %v288_v5  ;;  %v336_v22 = vsub.s32 (!%p175_p3), 4, %v710_v2  ;;  %v352_v23 = vsub.s32 (!%p175_p3), 5, %v710_v2 }
   0xd   : > { %247 = vst.msk [vmem:[#allocation2 + $0x5] sm:$0x1] (!%p175_p3), %vm238_vm1, %v654_v0  ;;  %v305_v14 = vrot.slane (!%p175_p3), %v263_v3, %v304_v6  ;;  %v743_v26 = vrot.slane (!%p175_p3), %v263_v3, %v320_v19  ;;  %v369_v31 = vsub.s32 (!%p175_p3), 6, %v710_v2  ;;  %v385_v32 = vsub.s32 (!%p175_p3), 7, %v710_v2 }
   0xe   : > { %246 = vst.msk [vmem:[#allocation2 + $0x28] sm:$0x3f] %vm236_vm0, %v654_v0  ;;  %s823_s12 = smov (!%p212_p4, %s644_s12), 1  ;;  %v282_v13 = vld [vmem:[#allocation2 + $0x1] sm:$0xf]  ;;  %v747_v38 = vrot.slane %v263_v3, %v336_v22  ;;  %v749_v41 = vrot.slane %v263_v3, %v352_v23 }
   0xf   : > { %252 = vst.msk [vmem:[#allocation2 + $0x2d] sm:$0x1] %vm238_vm1, %v654_v0  ;;  %s595_s16 = sshll.u32 %s823_s12, 4  ;;  %v290_v16 = vmul.f32 %v289_v12, %v282_v13  ;;  %v752_v49 = vrot.slane %v263_v3, %v369_v31  ;;  %v754_v50 = vrot.slane %v263_v3, %v385_v32 }
  0x10   : > { %s721_s21 = scalar_lea.vmem %s814_s0, %s595_s16  ;;  %s235_s28 = scalar_lea.vmem %s817_s3, %s595_s16 }
  0x11   : > { %v253_v7 = vld [vmem:[%s721_s21] sm:$0xf]  ;;  %v254_v8 = vld [vmem:[%s721_s21 + $0x4] sm:$0xf]  ;;  %v255_v9 = vld [vmem:[%s721_s21 + $0x8] sm:$0xf] }
  0x12   : > { %259 = vst.msk [vmem:[#allocation2 + $0x9] sm:$0xf] %vm258_vm2, %v253_v7  ;;  %260 = vst.msk [vmem:[#allocation2 + $0x11] sm:$0xf] %vm258_vm2, %v254_v8  ;;  %v256_v10 = vld [vmem:[%s721_s21 + $0xc] sm:$0xf] }
  0x13   : > { %261 = vst.msk [vmem:[#allocation2 + $0x19] sm:$0xf] %vm258_vm2, %v255_v9  ;;  %262 = vst.msk [vmem:[#allocation2 + $0x21] sm:$0xf] %vm258_vm2, %v256_v10  ;;  %v266_v15 = vld [vmem:[#allocation2] sm:$0xf] }
  0x14   : > { %v298_v17 = vld [vmem:[#allocation2 + $0x2] sm:$0xf]  ;;  %v274_v18 = vmul.f32 %v273_v11, %v266_v15 }
  0x15   : > { %v306_v21 = vmul.f32 %v305_v14, %v298_v17  ;;  %v456_v2 = vld [vmem:[%s721_s21 + $0x4] sm:$0xf] }
  0x16   : > { %v294_v20 = vadd.f32 %v290_v16, %v274_v18  ;;  %v592_v16 = vld [vmem:[%s815_s1 + $0x8] ss:$0 sm:$0xff] }
  0x18   : > { %v310_v37 = vadd.f32 %v306_v21, %v294_v20  ;;  %v769_v20 = vld [vmem:[%s816_s2] sm:$0xff] }
  0x19   : > { %v267_v24 = vld [vmem:[#allocation2 + $0x8] sm:$0xf]  ;;  %v268_v25 = vld [vmem:[#allocation2 + $0x10] sm:$0xf] }
  0x1a   : > { %v275_v27 = vmul.f32 %v273_v11, %v267_v24  ;;  %v276_v28 = vmul.f32 %v273_v11, %v268_v25  ;;  %v283_v29 = vld [vmem:[#allocation2 + $0x9] sm:$0xf]  ;;  %v284_v30 = vld [vmem:[#allocation2 + $0x11] sm:$0xf]  ;;  %v269_v42 = vld [vmem:[#allocation2 + $0x18] sm:$0xf] }
  0x1b   : > { %v291_v33 = vmul.f32 %v289_v12, %v283_v29  ;;  %v292_v34 = vmul.f32 %v289_v12, %v284_v30  ;;  %v299_v35 = vld [vmem:[#allocation2 + $0xa] sm:$0xf]  ;;  %v300_v36 = vld [vmem:[#allocation2 + $0x12] sm:$0xf]  ;;  %v285_v43 = vld [vmem:[#allocation2 + $0x19] sm:$0xf]  ;;  %v277_v61 = vmul.f32 %v273_v11, %v269_v42 }
  0x1c   : > { %v314_v39 = vld [vmem:[#allocation2 + $0x8] sm:$0xf]  ;;  %v307_v44 = vmul.f32 %v305_v14, %v299_v35  ;;  %v308_v48 = vmul.f32 %v305_v14, %v300_v36  ;;  %v315_v51 = vld [vmem:[#allocation2 + $0x10] sm:$0xf]  ;;  %v301_v54 = vld [vmem:[#allocation2 + $0x1a] sm:$0xf]  ;;  %v293_v62 = vmul.f32 %v289_v12, %v285_v43 }
  0x1d   : > { %v330_v40 = vld [vmem:[#allocation2 + $0x9] sm:$0xf]  ;;  %v322_v45 = vmul.f32 %v743_v26, %v314_v39  ;;  %v295_v47 = vadd.f32 %v291_v33, %v275_v27  ;;  %v331_v52 = vld [vmem:[#allocation2 + $0x11] sm:$0xf]  ;;  %v296_v53 = vadd.f32 %v292_v34, %v276_v28  ;;  %v323_v59 = vmul.f32 %v743_v26, %v315_v51  ;;  %v316_v1 = vld [vmem:[#allocation2 + $0x18] sm:$0xf] }
  0x1e   : > { %v346_v46 = vld [vmem:[#allocation2 + $0xa] sm:$0xf]  ;;  %v338_v56 = vmul.f32 %v747_v38, %v330_v40  ;;  %v363_v57 = vld [vmem:[#allocation2 + $0x10] sm:$0xf]  ;;  %v339_v0 = vmul.f32 %v747_v38, %v331_v52  ;;  %v332_v3 = vld [vmem:[#allocation2 + $0x19] sm:$0xf]  ;;  %v324_v15 = vmul.f32 %v743_v26, %v316_v1  ;;  %v309_v17 = vmul.f32 %v305_v14, %v301_v54 }
  0x1f   : > { %v326_v55 = vadd.f32 %v322_v45, %v310_v37  ;;  %v311_v58 = vadd.f32 %v307_v44, %v295_v47  ;;  %v347_v60 = vld [vmem:[#allocation2 + $0x12] sm:$0xf]  ;;  %v354_v63 = vmul.f32 %v749_v41, %v346_v46  ;;  %v364_v10 = vld [vmem:[#allocation2 + $0x18] sm:$0xf]  ;;  %v312_v13 = vadd.f32 %v308_v48, %v296_v53  ;;  %v317_v19 = vld [vmem:[#allocation2 + $0x20] sm:$0xf] }
  0x20   : > { %v379_v8 = vld [vmem:[#allocation2 + $0x11] sm:$0xf]  ;;  %v371_v11 = vmul.f32 %v752_v49, %v363_v57  ;;  %v355_v12 = vmul.f32 %v749_v41, %v347_v60  ;;  %v348_v18 = vld [vmem:[#allocation2 + $0x1a] sm:$0xf]  ;;  %v340_v27 = vmul.f32 %v747_v38, %v332_v3  ;;  %v372_v28 = vmul.f32 %v752_v49, %v364_v10  ;;  %v365_v29 = vld [vmem:[#allocation2 + $0x20] sm:$0xf] }
  0x21   : > { %v342_v7 = vadd.f32 %v338_v56, %v326_v55  ;;  %v327_v9 = vadd.f32 %v323_v59, %v311_v58  ;;  %v395_v22 = vld [vmem:[#allocation2 + $0x12] sm:$0xf]  ;;  %v380_v24 = vld [vmem:[#allocation2 + $0x19] sm:$0xf]  ;;  %v328_v25 = vadd.f32 %v324_v15, %v312_v13  ;;  %v387_v14 = vmul.f32 %v754_v50, %v379_v8  ;;  %v333_v37 = vld [vmem:[#allocation2 + $0x21] sm:$0xf] }
  0x22   : > { %v297_v30 = vadd.f32 %v293_v62, %v277_v61  ;;  %v325_v31 = vmul.f32 %v743_v26, %v317_v19  ;;  %v396_v34 = vld [vmem:[#allocation2 + $0x1a] sm:$0xf]  ;;  %v356_v36 = vmul.f32 %v749_v41, %v348_v18  ;;  %v403_v39 = vmul.f32 %v592_v16, %v395_v22  ;;  %v381_v43 = vld [vmem:[#allocation2 + $0x21] sm:$0xf]  ;;  %v366_v51 = vld [vmem:[#allocation2 + $0x28] sm:$0xf] }
  0x23   : > { %v358_v21 = vadd.f32 %v354_v63, %v342_v7  ;;  %v343_v23 = vadd.f32 %v339_v0, %v327_v9  ;;  %v344_v35 = vadd.f32 %v340_v27, %v328_v25  ;;  %v414_v40 = vrot.slane %v769_v20, %v272_v4  ;;  %v349_v48 = vld [vmem:[#allocation2 + $0x22] sm:$0xf]  ;;  %v382_v3 = vld [vmem:[#allocation2 + $0x29] sm:$0xf] }
  0x24   : > { %v388_v42 = vmul.f32 %v754_v50, %v380_v24  ;;  %v313_v44 = vadd.f32 %v309_v17, %v297_v30  ;;  %v373_v26 = vmul.f32 %v752_v49, %v365_v29  ;;  %v404_v52 = vmul.f32 %v592_v16, %v396_v34  ;;  %v397_v53 = vld [vmem:[#allocation2 + $0x22] sm:$0xf] }
  0x25   : > { %v375_v32 = vadd.f32 %v371_v11, %v358_v21  ;;  %v359_v33 = vadd.f32 %v355_v12, %v343_v23  ;;  %v360_v47 = vadd.f32 %v356_v36, %v344_v35  ;;  %v341_v55 = vmul.f32 %v747_v38, %v333_v37  ;;  %v398_v38 = vld [vmem:[#allocation2 + $0x2a] sm:$0xf]  ;;  %v455_v34 = vld [vmem:[%s721_s21] sm:$0xf] }
  0x26   : > { %v329_v54 = vadd.f32 %v325_v31, %v313_v44  ;;  %v389_v4 = vmul.f32 %v754_v50, %v381_v43  ;;  %v357_v60 = vmul.f32 %v749_v41, %v349_v48  ;;  %v374_v61 = vmul.f32 %v752_v49, %v366_v51  ;;  %v458_v48 = vld [vmem:[%s721_s21 + $0xc] sm:$0xf] }
  0x27   : > { %v391_v45 = vadd.f32 %v387_v14, %v375_v32  ;;  %v376_v46 = vadd.f32 %v372_v28, %v359_v33  ;;  %v377_v58 = vadd.f32 %v373_v26, %v360_v47  ;;  %v405_v1 = vmul.f32 %v592_v16, %v397_v53 }
  0x28   : > { %v345_v59 = vadd.f32 %v341_v55, %v329_v54  ;;  %v390_v15 = vmul.f32 %v754_v50, %v382_v3  ;;  %v406_v41 = vmul.f32 %v592_v16, %v398_v38  ;;  %v442_v50 = vrot.slane %v769_v20, %v288_v5 }
  0x29   : > { %v407_v56 = vadd.f32 %v403_v39, %v391_v45  ;;  %v392_v57 = vadd.f32 %v388_v42, %v376_v46  ;;  %v393_v0 = vadd.f32 %v389_v4, %v377_v58  ;;  %v450_v16 = vrot.slane %v769_v20, %v304_v6 }
  0x2a   : > { %v361_v7 = vadd.f32 %v357_v60, %v345_v59 }
  0x2b   : > { %v415_v62 = vadd.f32 %v414_v40, %v407_v56  ;;  %v408_v63 = vadd.f32 %v404_v52, %v392_v57  ;;  %v409_v10 = vadd.f32 %v405_v1, %v393_v0 }
  0x2c   : > { %v378_v13 = vadd.f32 %v374_v61, %v361_v7 }
  0x2d   : > { %v423_v8 = vmul.f32 0.70710677, %v415_v62  ;;  %v416_v9 = vadd.f32 %v414_v40, %v408_v63  ;;  %v417_v11 = vadd.f32 %v414_v40, %v409_v10  ;;  %v419_v23 = vmul.f32 0.5, %v415_v62 }
  0x2e   : > { %v394_v12 = vadd.f32 %v390_v15, %v378_v13 }
  0x2f   : > { %622 = verf.f32 %v423_v8  ;;  %v424_v17 = vmul.f32 0.70710677, %v416_v9  ;;  %v425_v49 = vmul.f32 0.70710677, %v417_v11  ;;  %v420_v14 = vmul.f32 0.5, %v416_v9 }
  0x30   : > { %v410_v18 = vadd.f32 %v406_v41, %v394_v12  ;;  %v421_v32 = vmul.f32 0.5, %v417_v11 }
  0x31   : > { %624 = verf.f32 %v424_v17 }
  0x32   : > { %626 = verf.f32 %v425_v49  ;;  %v418_v19 = vadd.f32 %v414_v40, %v410_v18  ;;  %v457_v40 = vld [vmem:[%s721_s21 + $0x8] sm:$0xf] }
  0x34   : > { %v426_v21 = vmul.f32 0.70710677, %v418_v19  ;;  %v422_v42 = vmul.f32 0.5, %v418_v19 }
  0x36   : > { %628 = verf.f32 %v426_v21 }
  0x39   : > { %v623_v22 = vpop.eup %622 }
  0x3a   : > { %v431_v24 = vadd.f32 1.0, %v623_v22 }
  0x3b   : > { %v625_v25 = vpop.eup %624 }
  0x3c   : > { %v435_v27 = vmul.f32 %v431_v24, %v419_v23  ;;  %v432_v28 = vadd.f32 1.0, %v625_v25  ;;  %v627_v29 = vpop.eup %626 }
  0x3d   : > { %v433_v33 = vadd.f32 1.0, %v627_v29 }
  0x3e   : > { %v443_v30 = vmul.f32 %v442_v50, %v435_v27  ;;  %v436_v31 = vmul.f32 %v432_v28, %v420_v14 }
  0x3f   : > { %v437_v37 = vmul.f32 %v433_v33, %v421_v32 }
  0x40   : > { %v451_v35 = vadd.f32 %v450_v16, %v443_v30  ;;  %v444_v36 = vmul.f32 %v442_v50, %v436_v31  ;;  %v629_v5 = vpop.eup %628 }
  0x41   : > { %v445_v39 = vmul.f32 %v442_v50, %v437_v37  ;;  %v434_v43 = vadd.f32 1.0, %v629_v5 }
  0x42   : > { %v459_v6 = vadd.f32 %v455_v34, %v451_v35  ;;  %v452_v20 = vadd.f32 %v450_v16, %v444_v36 }
  0x43   : > { %v453_v45 = vadd.f32 %v450_v16, %v445_v39  ;;  %v438_v46 = vmul.f32 %v434_v43, %v422_v42 }
  0x44   : > { %463 = vst.msk [vmem:[%s235_s28] sm:$0xf] %vm258_vm2, %v459_v6  ;;  %v460_v44 = vadd.f32 %v456_v2, %v452_v20 }
  0x45   : > { %v461_v47 = vadd.f32 %v457_v40, %v453_v45  ;;  %v446_v26 = vmul.f32 %v442_v50, %v438_v46 }
  0x46   : > { %464 = vst.msk [vmem:[%s235_s28 + $0x4] sm:$0xf] %vm258_vm2, %v460_v44 }
  0x47   : > { %465 = vst.msk [vmem:[%s235_s28 + $0x8] sm:$0xf] %vm258_vm2, %v461_v47  ;;  %v454_v51 = vadd.f32 %v450_v16, %v446_v26 }
  0x49   : > { %v462_v52 = vadd.f32 %v458_v48, %v454_v51 }
  0x4b   : > { %466 = vst.msk [vmem:[%s235_s28 + $0xc] sm:$0xf] %vm258_vm2, %v462_v52 }
  0x4c PF: > { %s13_s14 = sadd.s32 1, %s652_s14   ;;  %s818_s12 = smov %s648_s13 }
  0x4d   : > { %p10_p5 = scmp.ge.s32.totalorder %s13_s14, 4   ;;  %s819_s13 = smov %s821_s15 }
  0x4f   :  { %12 = sbr.rel (!%p10_p5) target bundleno = 2 (0x2), region = 71 }

// kernel: convmixer_forward.11
= control target key start
LH: loop header
LB: loop body
LE: loop exit
PB: predicated region body
PF: predicated region fallthrough
CT: control target
= control target key end

     0   :  { %vm20_vm0 = vcmask 254976   ;;  %v185_v0 = vmov 0.0   ;;  %vm186_vm1 = vmmov 0   ;;  %vm27_vm2 = vcmask 261120   ;;  %s248_s0 = inlined_call_operand.vmem [shape: f32[2,16,32], index: 0, kind: input, shape index: {}]   ;;  %s249_s1 = inlined_call_operand.vmem [shape: bf16[32,128], index: 1, kind: input, shape index: {}]   ;;  %s250_s2 = inlined_call_operand.vmem [shape: f32[1,128], index: 2, kind: input, shape index: {}]   ;;  %s251_s3 = inlined_call_operand.hbm [shape: f32[2,128], index: 3, kind: output, shape index: {}]  }
   0x1   :  { %21 = vst.msk [vmem:[#allocation2] sm:$0x3] %vm20_vm0, %v185_v0  ;;  %148 = vmatprep.subr.bf16.mxu0 %v185_v0  ;;  %v159_v1 = vld [vmem:[%s249_s1] sm:$0xff]   ;;  %152 = vmatprep.mubr.msk.bf16.mxu0 %vm186_vm1, %v185_v0  ;;  %v24_v3 = vld [vmem:[%s248_s0 + $0x8] sm:$0xff]  ;;  %v25_v5 = vld [vmem:[%s248_s0 + $0x10] sm:$0xff] }
   0x2   :  { %v23_v2 = vld [vmem:[%s248_s0] sm:$0xff]  ;;  %149 = vmatpush3.bf16.msra.mxu0 %v159_v1  ;;  %v160_v4 = vld [vmem:[%s249_s1 + $0x8] sm:$0xff]   ;;  %v26_v6 = vld [vmem:[%s248_s0 + $0x18] sm:$0xff]  ;;  %v29_v8 = vsel %vm27_vm2, %v24_v3, 0.0  ;;  %v37_v10 = vsel %vm27_vm2, %v25_v5, 0.0 }
   0x3   :  { %v28_v7 = vsel %vm27_vm2, %v23_v2, 0.0  ;;  %150 = vmatprep.subr.bf16.mxu0 %v185_v0  ;;  %v38_v11 = vsel %vm27_vm2, %v26_v6, 0.0 }
   0x4   :  { %v30_v9 = vadd.f32 %v29_v8, %v28_v7 }
   0x5   :  { %8 = vsyncpa [#allocation4], 0  ;;  %v39_v12 = vadd.f32 %v38_v11, %v37_v10  ;;  %vm48_vm3 = vcmask 1041409   ;;  %v141_v31 = vld [vmem:[%s250_s2] ss:$0 sm:$0xff]  ;;  %s187_s24 = smov [#allocation3]  }
   0x6   :  { %v31_v13 = vrot.slane %v30_v9, 4  ;;  %151 = vmatpush3.bf16.msra.mxu0 %v160_v4  ;;  %s133_s25 = sshll.u32 %s187_s24, 4  ;;  %s134_s25 = int_to_ptr.vmem [resolvable:$true] %s133_s25 }
   0x7   :  { %v40_v14 = vrot.slane %v39_v12, 4  ;;  %s161_s26 = scalar_lea.vmem %s134_s25, 32  ;;  %p166_p1 = scmp.lt.s32.totalorder %s134_s25, %s134_s25 }
   0x8   :  { %v32_v15 = vadd.f32 %v31_v13, %v30_v9  ;;  %v22_v24 = vld [vmem:[#allocation2] sm:$0x3]  ;;  %p162_p0 = scmp.ne.s32.totalorder %s134_s25, %s161_s26  ;;  %p167_p2 = scmp.lt.s32.totalorder %s161_s26, %s161_s26 }
   0x9   :  { %v41_v16 = vadd.f32 %v40_v14, %v39_v12 }
   0xa   :  { %v33_v17 = vrot.slane %v32_v15, 2  ;;  %p168_p3 = por %p167_p2, %p166_p1 }
   0xb   :  { %v42_v18 = vrot.slane %v41_v16, 2 }
   0xc   :  { %v34_v19 = vadd.f32 %v33_v17, %v32_v15  ;;  %p169_p4 = pnand %p168_p3, %p162_p0 }
   0xd   :  { %v43_v20 = vadd.f32 %v42_v18, %v41_v16 }
   0xe   :  { %v35_v21 = vrot.slane %v34_v19, 1 }
   0xf   :  { %v44_v22 = vrot.slane %v43_v20, 1 }
  0x10   :  { %v36_v23 = vadd.f32 %v35_v21, %v34_v19 }
  0x11   :  { %v45_v25 = vadd.f32 %v44_v22, %v43_v20 }
  0x13   :  { %v49_v26 = vsel %vm48_vm3, %v45_v25, %v36_v23 }
  0x14   :  { %v51_v27 = vadd.f32 %v49_v26, %v22_v24 }
  0x16   :  { %53 = vst.msk [vmem:[#allocation2] sm:$0x3] %vm20_vm0, %v51_v27 }
  0x1d   :  { %v57_v28 = vld [vmem:[#allocation2] sm:$0x3] }
  0x1e   :  { %v58_v29 = vmul.f32 0.0625, %v57_v28 }
  0x20   :  { %v59_v30 = vpack.c.bf16 %v58_v29, %v58_v29 }
  0x22   :  { %153 = vmatmul.mubr.msk.bf16.vlgmr.msra.gmra.mrb[0].mxu0 %vm27_vm2, %v59_v30 }
  0xf5   :  { %v120_v32 = vpop.f32.mrb[0].mxu0 }
  0xf6   :  { %v121_v33 = vadd.f32 %v141_v31, %v120_v32  ;;  %v154_v34 = vpop.f32.mrb[1].mxu0 }
  0xf7   :  { %v123_v35 = vpop.f32.mrb[2].mxu0 }
  0xf8   :  { %126 = vst [vmem:[#allocation3] sm:$0x3] %v121_v33  ;;  %v155_v36 = vpop.f32.mrb[3].mxu0 }
  0xf9   :  { %172 = shalt.err (!%p169_p4)
}
  0xfa   :  { %s173_s2 = scalar_lea.hbm %s251_s3, 32 }
  0xfb   :  { %p174_p5 = scmp.ne.s32.totalorder %s251_s3, %s173_s2  ;;  %p177_p6 = scmp.lt.u32.totalorder %s173_s2, %s251_s3 }
  0xfd   :  { %p179_p7 = pnand %p177_p6, %p174_p5 }
  0xff   :  { %182 = shalt.err (!%p179_p7)
}
 0x100   :  { %136 = dma.vmem_to_hbm [thread:$0]  %s134_s25, 32, %s251_s3, [#allocation4]  }
 0x101   :  { %183 = dma.done.wait [#allocation4], 32  }
 0x102   :  { %184 = vsyncadd [#allocation4], 4294967264 }
 0x103   :  { %140 = vsyncpa [#allocation4], 1 }

</bundles_post_ra>
